<compile_context>
chip_gen: v6e
topology: v6e:2x2x1
jax: 0.10.0
libtpu: 0.0.40
codegen_flags: <defaults>
</compile_context>

<pallas_src>
import jax
import jax.numpy as jnp
from jax import lax
from jax.experimental import pallas as pl
from jax.experimental.pallas import tpu as pltpu

N_PAD = 128  # lane padding for all node-axis vectors


def _row_to_col(row):
    """(1,128) row -> (128,128) with out[i, j] = row[0, i] (broadcast + XLU transpose)."""
    return jnp.broadcast_to(row, (N_PAD, N_PAD)).T


def _hash_keys(lane_i32, seed, salt):
    """Deterministic pseudo-random 17-bit integer key per lane (pure int32 VPU math)."""
    x = lane_i32 * jnp.int32(2654435) + seed * jnp.int32(40503) + jnp.int32(salt * 977 + 1013)
    x = (x * jnp.int32(1103515245) + jnp.int32(12345)) & jnp.int32(0x7FFFFFFF)
    x = (x * jnp.int32(214013) + jnp.int32(2531011) + lane_i32 * jnp.int32(97)) & jnp.int32(0x7FFFFFFF)
    return x & jnp.int32(0x1FFFF)  # < 2^17


def _apply_random_masking(v_row, keys_i32, lane_i32, valid, num_to_mask_f):
    """Zero exactly num_to_mask of the `valid` lanes of v_row (rank of hash keys)."""
    # combined key = key*128 + lane  (< 2^24 -> exact in f32, unique per lane)
    combined = (keys_i32 * jnp.int32(N_PAD) + lane_i32).astype(jnp.float32)
    key_row = jnp.where(valid, combined, jnp.float32(1 << 25))       # (1, 128)
    key_col = _row_to_col(key_row)                                    # varies along dim0 (k)
    key_j = jnp.broadcast_to(key_row, (N_PAD, N_PAD))                 # varies along dim1 (j)
    less = (key_col < key_j).astype(jnp.float32)
    rank = jnp.sum(less, axis=0, keepdims=True)                       # (1, 128)
    to_zero = (rank < num_to_mask_f) & valid
    return jnp.where(to_zero, 0.0, v_row)


def _multiview_kernel(iparams_ref, fparams_ref, graph_ref,
                      subseq_ref, subspace_ref, count_ref):
    L = iparams_ref[0]            # sequence_length
    seed = iparams_ref[1]
    n = iparams_ref[2]            # true graph length
    nm_seq = iparams_ref[3]       # host-computed int(sequence_length * mask_ratio)
    center = fparams_ref[0]
    dist_thr = fparams_ref[1]
    mask_ratio = fparams_ref[2]

    g = graph_ref[...]                                        # (1, N_PAD)
    lane = lax.broadcasted_iota(jnp.int32, (1, N_PAD), 1)
    i_iota = lax.broadcasted_iota(jnp.int32, (N_PAD, N_PAD), 0)
    j_iota = lax.broadcasted_iota(jnp.int32, (N_PAD, N_PAD), 1)
    j_iota_f = j_iota.astype(jnp.float32)
    g_col = _row_to_col(g)                                    # g_col[i, j] = g[i]

    # ---- deterministic pseudo-random start index in [0, n - L] ----
    h = (seed + n * jnp.int32(31) + L * jnp.int32(7)) * jnp.int32(1103515245) + jnp.int32(12345)
    h = h & jnp.int32(0x7FFFFFFF)
    start = h % (n - L + 1)

    # ---- subsequence crop: subseq[j] = g[start + j], j in [0, L) ----
    sel = i_iota == (j_iota + start)
    subseq = jnp.sum(jnp.where(sel, g_col, 0.0), axis=0, keepdims=True)
    valid_seq = lane < L
    subseq = jnp.where(valid_seq, subseq, 0.0)

    # ---- subspace crop: keep |g - center| <= thr, left-compact ----
    valid_n = lane < n
    qual = valid_n & (jnp.abs(g - center) <= dist_thr)
    qual_f = qual.astype(jnp.float32)
    count_11 = jnp.sum(qual_f, axis=1, keepdims=True)                  # (1, 1) total count
    qual_col = _row_to_col(qual_f)                                     # varies along dim0 (src)
    prefix = jnp.sum(jnp.where(i_iota <= j_iota, qual_col, 0.0),
                     axis=0, keepdims=True)                            # inclusive prefix sum
    pos = prefix - 1.0                                                 # output slot per source node
    pos_col = _row_to_col(pos)
    keep = (pos_col == j_iota_f) & (qual_col > 0.5)
    subspace = jnp.sum(jnp.where(keep, g_col, 0.0), axis=0, keepdims=True)

    # ---- random edge masking: zero exactly int(len * mask_ratio) elements ----
    keys_seq = _hash_keys(lane, seed, 0)
    keys_sub = _hash_keys(lane, seed, 1)
    nm_seq_f = nm_seq.astype(jnp.float32)
    nm_sub_f = jnp.floor(count_11 * mask_ratio)                        # int() truncation (>=0)
    valid_sub = lane.astype(jnp.float32) < count_11
    subseq = _apply_random_masking(subseq, keys_seq, lane, valid_seq, nm_seq_f)
    subspace = _apply_random_masking(subspace, keys_sub, lane, valid_sub, nm_sub_f)

    subseq_ref[...] = subseq
    subspace_ref[...] = subspace
    count_ref[...] = jnp.broadcast_to(count_11, (1, N_PAD)).astype(jnp.int32)


_multiview_call = pl.pallas_call(
    _multiview_kernel,
    in_specs=[
        pl.BlockSpec(memory_space=pltpu.MemorySpace.SMEM),   # iparams
        pl.BlockSpec(memory_space=pltpu.MemorySpace.SMEM),   # fparams
        pl.BlockSpec(memory_space=pltpu.MemorySpace.VMEM),   # graph row
    ],
    out_specs=[
        pl.BlockSpec(memory_space=pltpu.MemorySpace.VMEM),
        pl.BlockSpec(memory_space=pltpu.MemorySpace.VMEM),
        pl.BlockSpec(memory_space=pltpu.MemorySpace.VMEM),
    ],
    out_shape=[
        jax.ShapeDtypeStruct((1, N_PAD), jnp.float32),
        jax.ShapeDtypeStruct((1, N_PAD), jnp.float32),
        jax.ShapeDtypeStruct((1, N_PAD), jnp.int32),
    ],
)


def multiview_contrastive_forward(graph, sequence_length, center_node,
                                  distance_threshold, mask_ratio, seed=0):
    graph = jnp.asarray(graph, jnp.float32)
    n = int(graph.shape[0])
    assert 1 <= sequence_length <= n <= N_PAD
    g_pad = jnp.zeros((1, N_PAD), jnp.float32).at[0, :n].set(graph)
    nm_seq = int(sequence_length * mask_ratio)        # exact Python int() semantics
    iparams = jnp.array([sequence_length, seed, n, nm_seq], jnp.int32)
    fparams = jnp.array([center_node, distance_threshold, mask_ratio, 0.0], jnp.float32)

    subseq_p, subspace_p, counts = _multiview_call(iparams, fparams, g_pad)

    # Single device->host sync to learn the variable subspace length.
    count = int(counts[0, 0])
    subsequence_view = subseq_p[0, :sequence_length]   # fixed length = sequence_length
    subspace_view = subspace_p[0, :count]              # variable length = #qualifying nodes
    return subsequence_view, subspace_view


class MultiviewContrastiveLayer:
    """JAX/Pallas counterpart of the PyTorch module (no learned parameters)."""

    def __init__(self, input_size, view_size):
        self.input_size = input_size
        self.view_size = view_size

    def forward(self, graph, sequence_length, center_node, distance_threshold,
                mask_ratio, seed=0):
        return multiview_contrastive_forward(graph, sequence_length, center_node,
                                             distance_threshold, mask_ratio, seed)


if __name__ == "__main__":
    key = jax.random.PRNGKey(0)
    graph = jax.random.normal(key, (16,), dtype=jnp.float32)   # 16 node values

    layer = MultiviewContrastiveLayer(input_size=16, view_size=8)
    sequence_length = 8
    center_node = 0.25
    distance_threshold = 0.75
    mask_ratio = 0.25

    subseq, subspace = layer.forward(graph, sequence_length, center_node,
                                     distance_threshold, mask_ratio, seed=0)
    jax.block_until_ready((subseq, subspace))

    # light sanity checks on the semantics
    assert subseq.shape == (sequence_length,)
    g_np = jax.device_get(graph)
    sub_np = jax.device_get(subspace)
    expected_count = sum(1 for v in g_np
                         if abs(float(v) - center_node) <= distance_threshold)
    assert sub_np.shape[0] == expected_count
    for v in sub_np:
        if float(v) != 0.0:
            assert abs(float(v) - center_node) <= distance_threshold + 1e-6

    print("KERNEL_OK")
</pallas_src>

<mosaic_0001>
module attributes {stable_mosaic.version = 11 : i64} {
  func.func @_multiview_kernel(%arg0: memref<4xi32, #tpu.memory_space<smem>>, %arg1: memref<4xf32, #tpu.memory_space<smem>>, %arg2: memref<1x128xf32, #tpu.memory_space<vmem>>, %arg3: memref<1x128xf32, #tpu.memory_space<vmem>>, %arg4: memref<1x128xf32, #tpu.memory_space<vmem>>, %arg5: memref<1x128xi32, #tpu.memory_space<vmem>>) attributes {dimension_semantics = [], scalar_prefetch = 0 : i64, scratch_operands = 0 : i64, tpu.core_type = #tpu.core_type<tc>} {
    %c0 = arith.constant 0 : index
    %0 = memref.load %arg0[%c0] : memref<4xi32, #tpu.memory_space<smem>>
    %c1 = arith.constant 1 : index
    %1 = memref.load %arg0[%c1] : memref<4xi32, #tpu.memory_space<smem>>
    %c2 = arith.constant 2 : index
    %2 = memref.load %arg0[%c2] : memref<4xi32, #tpu.memory_space<smem>>
    %c3 = arith.constant 3 : index
    %3 = memref.load %arg0[%c3] : memref<4xi32, #tpu.memory_space<smem>>
    %c0_0 = arith.constant 0 : index
    %4 = memref.load %arg1[%c0_0] : memref<4xf32, #tpu.memory_space<smem>>
    %c1_1 = arith.constant 1 : index
    %5 = memref.load %arg1[%c1_1] : memref<4xf32, #tpu.memory_space<smem>>
    %c2_2 = arith.constant 2 : index
    %6 = memref.load %arg1[%c2_2] : memref<4xf32, #tpu.memory_space<smem>>
    %c0_3 = arith.constant 0 : index
    %c0_4 = arith.constant 0 : index
    %7 = vector.load %arg2[%c0_3, %c0_4] : memref<1x128xf32, #tpu.memory_space<vmem>>, vector<1x128xf32>
    %8 = tpu.iota {dimensions = array<i32: 1>} : vector<1x128xi32>
    %9 = tpu.iota {dimensions = array<i32: 0>} : vector<128x128xi32>
    %10 = tpu.iota {dimensions = array<i32: 1>} : vector<128x128xi32>
    %11 = arith.sitofp %10 : vector<128x128xi32> to vector<128x128xf32>
    %12 = vector.shape_cast %7 : vector<1x128xf32> to vector<1x128xf32>
    %13 = vector.broadcast %12 : vector<1x128xf32> to vector<128x128xf32>
    %14 = tpu.transpose %13, [1, 0] : vector<128x128xf32> -> vector<128x128xf32>
    %c31_i32 = arith.constant 31 : i32
    %15 = arith.muli %2, %c31_i32 : i32
    %16 = arith.addi %1, %15 : i32
    %c7_i32 = arith.constant 7 : i32
    %17 = arith.muli %0, %c7_i32 : i32
    %18 = arith.addi %16, %17 : i32
    %c1103515245_i32 = arith.constant 1103515245 : i32
    %19 = arith.muli %18, %c1103515245_i32 : i32
    %c12345_i32 = arith.constant 12345 : i32
    %20 = arith.addi %19, %c12345_i32 : i32
    %c2147483647_i32 = arith.constant 2147483647 : i32
    %21 = arith.andi %20, %c2147483647_i32 : i32
    %22 = arith.subi %2, %0 : i32
    %c1_i32 = arith.constant 1 : i32
    %23 = arith.addi %22, %c1_i32 : i32
    %c0_i32 = arith.constant 0 : i32
    %24 = arith.cmpi eq, %23, %c0_i32 : i32
    %c1_i32_5 = arith.constant 1 : i32
    %25 = arith.select %24, %c1_i32_5, %23 : i32
    %26 = arith.remsi %21, %25 : i32
    %c0_i32_6 = arith.constant 0 : i32
    %27 = arith.cmpi ne, %26, %c0_i32_6 : i32
    %c0_i32_7 = arith.constant 0 : i32
    %28 = arith.cmpi slt, %26, %c0_i32_7 : i32
    %c0_i32_8 = arith.constant 0 : i32
    %29 = arith.cmpi slt, %25, %c0_i32_8 : i32
    %30 = arith.xori %28, %29 : i1
    %31 = arith.andi %30, %27 : i1
    %32 = arith.addi %26, %25 : i32
    %33 = arith.select %31, %32, %26 : i32
    %34 = vector.broadcast %33 : i32 to vector<128x128xi32>
    %35 = arith.addi %10, %34 : vector<128x128xi32>
    %36 = arith.cmpi eq, %9, %35 : vector<128x128xi32>
    %cst = arith.constant 0.000000e+00 : f32
    %37 = vector.broadcast %cst : f32 to vector<128x128xf32>
    %38 = arith.select %36, %14, %37 : vector<128x128xi1>, vector<128x128xf32>
    %cst_9 = arith.constant dense<0.000000e+00> : vector<128xf32>
    %39 = vector.multi_reduction <add>, %38, %cst_9 [0] : vector<128x128xf32> to vector<128xf32>
    %40 = vector.shape_cast %39 : vector<128xf32> to vector<1x128xf32>
    %41 = vector.broadcast %0 : i32 to vector<1x128xi32>
    %42 = arith.cmpi slt, %8, %41 : vector<1x128xi32>
    %cst_10 = arith.constant 0.000000e+00 : f32
    %43 = vector.broadcast %cst_10 : f32 to vector<1x128xf32>
    %44 = arith.select %42, %40, %43 : vector<1x128xi1>, vector<1x128xf32>
    %45 = vector.broadcast %2 : i32 to vector<1x128xi32>
    %46 = arith.cmpi slt, %8, %45 : vector<1x128xi32>
    %47 = vector.broadcast %4 : f32 to vector<1x128xf32>
    %48 = arith.subf %7, %47 : vector<1x128xf32>
    %49 = math.absf %48 : vector<1x128xf32>
    %50 = vector.broadcast %5 : f32 to vector<1x128xf32>
    %51 = arith.cmpf ole, %49, %50 : vector<1x128xf32>
    %52 = arith.andi %46, %51 : vector<1x128xi1>
    %53 = arith.extui %52 : vector<1x128xi1> to vector<1x128xi32>
    %54 = arith.sitofp %53 : vector<1x128xi32> to vector<1x128xf32>
    %cst_11 = arith.constant dense<0.000000e+00> : vector<1xf32>
    %55 = vector.multi_reduction <add>, %54, %cst_11 [1] : vector<1x128xf32> to vector<1xf32>
    %56 = vector.shape_cast %55 : vector<1xf32> to vector<1x1xf32>
    %57 = vector.shape_cast %54 : vector<1x128xf32> to vector<1x128xf32>
    %58 = vector.broadcast %57 : vector<1x128xf32> to vector<128x128xf32>
    %59 = tpu.transpose %58, [1, 0] : vector<128x128xf32> -> vector<128x128xf32>
    %60 = arith.cmpi sle, %9, %10 : vector<128x128xi32>
    %cst_12 = arith.constant 0.000000e+00 : f32
    %61 = vector.broadcast %cst_12 : f32 to vector<128x128xf32>
    %62 = arith.select %60, %59, %61 : vector<128x128xi1>, vector<128x128xf32>
    %cst_13 = arith.constant dense<0.000000e+00> : vector<128xf32>
    %63 = vector.multi_reduction <add>, %62, %cst_13 [0] : vector<128x128xf32> to vector<128xf32>
    %64 = vector.shape_cast %63 : vector<128xf32> to vector<1x128xf32>
    %cst_14 = arith.constant 1.000000e+00 : f32
    %65 = vector.broadcast %cst_14 : f32 to vector<1x128xf32>
    %66 = arith.subf %64, %65 : vector<1x128xf32>
    %67 = vector.shape_cast %66 : vector<1x128xf32> to vector<1x128xf32>
    %68 = vector.broadcast %67 : vector<1x128xf32> to vector<128x128xf32>
    %69 = tpu.transpose %68, [1, 0] : vector<128x128xf32> -> vector<128x128xf32>
    %70 = arith.cmpf oeq, %69, %11 : vector<128x128xf32>
    %cst_15 = arith.constant 5.000000e-01 : f32
    %71 = vector.broadcast %cst_15 : f32 to vector<128x128xf32>
    %72 = arith.cmpf ogt, %59, %71 : vector<128x128xf32>
    %73 = arith.andi %70, %72 : vector<128x128xi1>
    %cst_16 = arith.constant 0.000000e+00 : f32
    %74 = vector.broadcast %cst_16 : f32 to vector<128x128xf32>
    %75 = arith.select %73, %14, %74 : vector<128x128xi1>, vector<128x128xf32>
    %cst_17 = arith.constant dense<0.000000e+00> : vector<128xf32>
    %76 = vector.multi_reduction <add>, %75, %cst_17 [0] : vector<128x128xf32> to vector<128xf32>
    %77 = vector.shape_cast %76 : vector<128xf32> to vector<1x128xf32>
    %c2654435_i32 = arith.constant 2654435 : i32
    %78 = vector.broadcast %c2654435_i32 : i32 to vector<1x128xi32>
    %79 = arith.muli %8, %78 : vector<1x128xi32>
    %c40503_i32 = arith.constant 40503 : i32
    %80 = arith.muli %1, %c40503_i32 : i32
    %81 = vector.broadcast %80 : i32 to vector<1x128xi32>
    %82 = arith.addi %79, %81 : vector<1x128xi32>
    %c1013_i32 = arith.constant 1013 : i32
    %83 = vector.broadcast %c1013_i32 : i32 to vector<1x128xi32>
    %84 = arith.addi %82, %83 : vector<1x128xi32>
    %c1103515245_i32_18 = arith.constant 1103515245 : i32
    %85 = vector.broadcast %c1103515245_i32_18 : i32 to vector<1x128xi32>
    %86 = arith.muli %84, %85 : vector<1x128xi32>
    %c12345_i32_19 = arith.constant 12345 : i32
    %87 = vector.broadcast %c12345_i32_19 : i32 to vector<1x128xi32>
    %88 = arith.addi %86, %87 : vector<1x128xi32>
    %c2147483647_i32_20 = arith.constant 2147483647 : i32
    %89 = vector.broadcast %c2147483647_i32_20 : i32 to vector<1x128xi32>
    %90 = arith.andi %88, %89 : vector<1x128xi32>
    %c214013_i32 = arith.constant 214013 : i32
    %91 = vector.broadcast %c214013_i32 : i32 to vector<1x128xi32>
    %92 = arith.muli %90, %91 : vector<1x128xi32>
    %c2531011_i32 = arith.constant 2531011 : i32
    %93 = vector.broadcast %c2531011_i32 : i32 to vector<1x128xi32>
    %94 = arith.addi %92, %93 : vector<1x128xi32>
    %c97_i32 = arith.constant 97 : i32
    %95 = vector.broadcast %c97_i32 : i32 to vector<1x128xi32>
    %96 = arith.muli %8, %95 : vector<1x128xi32>
    %97 = arith.addi %94, %96 : vector<1x128xi32>
    %c2147483647_i32_21 = arith.constant 2147483647 : i32
    %98 = vector.broadcast %c2147483647_i32_21 : i32 to vector<1x128xi32>
    %99 = arith.andi %97, %98 : vector<1x128xi32>
    %c131071_i32 = arith.constant 131071 : i32
    %100 = vector.broadcast %c131071_i32 : i32 to vector<1x128xi32>
    %101 = arith.andi %99, %100 : vector<1x128xi32>
    %c2654435_i32_22 = arith.constant 2654435 : i32
    %102 = vector.broadcast %c2654435_i32_22 : i32 to vector<1x128xi32>
    %103 = arith.muli %8, %102 : vector<1x128xi32>
    %c40503_i32_23 = arith.constant 40503 : i32
    %104 = arith.muli %1, %c40503_i32_23 : i32
    %105 = vector.broadcast %104 : i32 to vector<1x128xi32>
    %106 = arith.addi %103, %105 : vector<1x128xi32>
    %c1990_i32 = arith.constant 1990 : i32
    %107 = vector.broadcast %c1990_i32 : i32 to vector<1x128xi32>
    %108 = arith.addi %106, %107 : vector<1x128xi32>
    %c1103515245_i32_24 = arith.constant 1103515245 : i32
    %109 = vector.broadcast %c1103515245_i32_24 : i32 to vector<1x128xi32>
    %110 = arith.muli %108, %109 : vector<1x128xi32>
    %c12345_i32_25 = arith.constant 12345 : i32
    %111 = vector.broadcast %c12345_i32_25 : i32 to vector<1x128xi32>
    %112 = arith.addi %110, %111 : vector<1x128xi32>
    %c2147483647_i32_26 = arith.constant 2147483647 : i32
    %113 = vector.broadcast %c2147483647_i32_26 : i32 to vector<1x128xi32>
    %114 = arith.andi %112, %113 : vector<1x128xi32>
    %c214013_i32_27 = arith.constant 214013 : i32
    %115 = vector.broadcast %c214013_i32_27 : i32 to vector<1x128xi32>
    %116 = arith.muli %114, %115 : vector<1x128xi32>
    %c2531011_i32_28 = arith.constant 2531011 : i32
    %117 = vector.broadcast %c2531011_i32_28 : i32 to vector<1x128xi32>
    %118 = arith.addi %116, %117 : vector<1x128xi32>
    %c97_i32_29 = arith.constant 97 : i32
    %119 = vector.broadcast %c97_i32_29 : i32 to vector<1x128xi32>
    %120 = arith.muli %8, %119 : vector<1x128xi32>
    %121 = arith.addi %118, %120 : vector<1x128xi32>
    %c2147483647_i32_30 = arith.constant 2147483647 : i32
    %122 = vector.broadcast %c2147483647_i32_30 : i32 to vector<1x128xi32>
    %123 = arith.andi %121, %122 : vector<1x128xi32>
    %c131071_i32_31 = arith.constant 131071 : i32
    %124 = vector.broadcast %c131071_i32_31 : i32 to vector<1x128xi32>
    %125 = arith.andi %123, %124 : vector<1x128xi32>
    %126 = arith.sitofp %3 : i32 to f32
    %127 = vector.broadcast %6 : f32 to vector<1x1xf32>
    %128 = arith.mulf %56, %127 : vector<1x1xf32>
    %129 = math.floor %128 : vector<1x1xf32>
    %130 = arith.sitofp %8 : vector<1x128xi32> to vector<1x128xf32>
    %131 = vector.broadcast %56 : vector<1x1xf32> to vector<1x128xf32>
    %132 = arith.cmpf olt, %130, %131 : vector<1x128xf32>
    %c128_i32 = arith.constant 128 : i32
    %133 = vector.broadcast %c128_i32 : i32 to vector<1x128xi32>
    %134 = arith.muli %101, %133 : vector<1x128xi32>
    %135 = arith.addi %134, %8 : vector<1x128xi32>
    %136 = arith.sitofp %135 : vector<1x128xi32> to vector<1x128xf32>
    %cst_32 = arith.constant 0x4C000000 : f32
    %137 = vector.broadcast %cst_32 : f32 to vector<1x128xf32>
    %138 = arith.select %42, %136, %137 : vector<1x128xi1>, vector<1x128xf32>
    %139 = vector.shape_cast %138 : vector<1x128xf32> to vector<1x128xf32>
    %140 = vector.broadcast %139 : vector<1x128xf32> to vector<128x128xf32>
    %141 = tpu.transpose %140, [1, 0] : vector<128x128xf32> -> vector<128x128xf32>
    %142 = vector.shape_cast %138 : vector<1x128xf32> to vector<1x128xf32>
    %143 = vector.broadcast %142 : vector<1x128xf32> to vector<128x128xf32>
    %144 = arith.cmpf olt, %141, %143 : vector<128x128xf32>
    %145 = arith.extui %144 : vector<128x128xi1> to vector<128x128xi32>
    %146 = arith.sitofp %145 : vector<128x128xi32> to vector<128x128xf32>
    %cst_33 = arith.constant dense<0.000000e+00> : vector<128xf32>
    %147 = vector.multi_reduction <add>, %146, %cst_33 [0] : vector<128x128xf32> to vector<128xf32>
    %148 = vector.shape_cast %147 : vector<128xf32> to vector<1x128xf32>
    %149 = vector.broadcast %126 : f32 to vector<1x128xf32>
    %150 = arith.cmpf olt, %148, %149 : vector<1x128xf32>
    %151 = arith.andi %150, %42 : vector<1x128xi1>
    %cst_34 = arith.constant 0.000000e+00 : f32
    %152 = vector.broadcast %cst_34 : f32 to vector<1x128xf32>
    %153 = arith.select %151, %152, %44 : vector<1x128xi1>, vector<1x128xf32>
    %c128_i32_35 = arith.constant 128 : i32
    %154 = vector.broadcast %c128_i32_35 : i32 to vector<1x128xi32>
    %155 = arith.muli %125, %154 : vector<1x128xi32>
    %156 = arith.addi %155, %8 : vector<1x128xi32>
    %157 = arith.sitofp %156 : vector<1x128xi32> to vector<1x128xf32>
    %cst_36 = arith.constant 0x4C000000 : f32
    %158 = vector.broadcast %cst_36 : f32 to vector<1x128xf32>
    %159 = arith.select %132, %157, %158 : vector<1x128xi1>, vector<1x128xf32>
    %160 = vector.shape_cast %159 : vector<1x128xf32> to vector<1x128xf32>
    %161 = vector.broadcast %160 : vector<1x128xf32> to vector<128x128xf32>
    %162 = tpu.transpose %161, [1, 0] : vector<128x128xf32> -> vector<128x128xf32>
    %163 = vector.shape_cast %159 : vector<1x128xf32> to vector<1x128xf32>
    %164 = vector.broadcast %163 : vector<1x128xf32> to vector<128x128xf32>
    %165 = arith.cmpf olt, %162, %164 : vector<128x128xf32>
    %166 = arith.extui %165 : vector<128x128xi1> to vector<128x128xi32>
    %167 = arith.sitofp %166 : vector<128x128xi32> to vector<128x128xf32>
    %cst_37 = arith.constant dense<0.000000e+00> : vector<128xf32>
    %168 = vector.multi_reduction <add>, %167, %cst_37 [0] : vector<128x128xf32> to vector<128xf32>
    %169 = vector.shape_cast %168 : vector<128xf32> to vector<1x128xf32>
    %170 = vector.broadcast %129 : vector<1x1xf32> to vector<1x128xf32>
    %171 = arith.cmpf olt, %169, %170 : vector<1x128xf32>
    %172 = arith.andi %171, %132 : vector<1x128xi1>
    %cst_38 = arith.constant 0.000000e+00 : f32
    %173 = vector.broadcast %cst_38 : f32 to vector<1x128xf32>
    %174 = arith.select %172, %173, %77 : vector<1x128xi1>, vector<1x128xf32>
    %c0_39 = arith.constant 0 : index
    %c0_40 = arith.constant 0 : index
    %175 = vector.load %arg3[%c0_39, %c0_40] : memref<1x128xf32, #tpu.memory_space<vmem>>, vector<1x128xf32>
    tpu.vector_store %arg3[%c0_39, %c0_40], %153 {strides = array<i32>} : memref<1x128xf32, #tpu.memory_space<vmem>>, vector<1x128xf32>,
    %c0_41 = arith.constant 0 : index
    %c0_42 = arith.constant 0 : index
    %176 = vector.load %arg4[%c0_41, %c0_42] : memref<1x128xf32, #tpu.memory_space<vmem>>, vector<1x128xf32>
    tpu.vector_store %arg4[%c0_41, %c0_42], %174 {strides = array<i32>} : memref<1x128xf32, #tpu.memory_space<vmem>>, vector<1x128xf32>,
    %177 = vector.shape_cast %56 : vector<1x1xf32> to vector<1x1xf32>
    %178 = vector.broadcast %177 : vector<1x1xf32> to vector<1x128xf32>
    %179 = arith.fptosi %178 : vector<1x128xf32> to vector<1x128xi32>
    %c0_43 = arith.constant 0 : index
    %c0_44 = arith.constant 0 : index
    %180 = vector.load %arg5[%c0_43, %c0_44] : memref<1x128xi32, #tpu.memory_space<vmem>>, vector<1x128xi32>
    tpu.vector_store %arg5[%c0_43, %c0_44], %179 {strides = array<i32>} : memref<1x128xi32, #tpu.memory_space<vmem>>, vector<1x128xi32>,
    return
  }
}

</mosaic_0001>

<bundles_post_ra>
// kernel: tpu_custom_call.1
= control target key start
LH: loop header
LB: loop body
LE: loop exit
PB: predicated region body
PF: predicated region fallthrough
CT: control target
= control target key end

     0   :  { %11 = vsyncpa [#allocation4], 0  ;;  %s1418_s0 = inlined_call_operand.hbm [shape: s32[4], index: 0, kind: input, shape index: {}]   ;;  %s1419_s1 = inlined_call_operand.vmem [shape: f32[4], index: 1, kind: input, shape index: {}]   ;;  %s1420_s2 = inlined_call_operand.vmem [shape: f32[1,128], index: 2, kind: input, shape index: {}]   ;;  %s1421_s3 = inlined_call_operand.hbm [shape: f32[1,128], index: 3, kind: output, shape index: {0}]   ;;  %s1422_s4 = inlined_call_operand.hbm [shape: f32[1,128], index: 4, kind: output, shape index: {1}]   ;;  %s1423_s5 = inlined_call_operand.hbm [shape: s32[1,128], index: 5, kind: output, shape index: {2}]  }
   0x1   :  { %12 = vsyncpa [#allocation5], 0 }
   0x2   :  { %13 = vsyncpa [#allocation3], 0 }
   0x3   :  { %14 = vsyncpa [#allocation9], 0  ;;  %s29_s20 = sshll.u32 %s1419_s1, 4  ;;  %s860_s21 = smov [#allocation2]   ;;  %s30_s20 = int_to_ptr.vmem [resolvable:$true] %s29_s20 }
   0x4   :  { %22 = dma.hbm_to_smem %s1418_s0, 16, %s860_s21, [#allocation4]  }
   0x5   :  { %s780_s24 = scalar_lea.vmem %s30_s20, 16  ;;  %p785_p1 = scmp.lt.s32.totalorder %s30_s20, %s30_s20 }
   0x6   :  { %p781_p0 = scmp.ne.s32.totalorder %s30_s20, %s780_s24  ;;  %p786_p2 = scmp.lt.s32.totalorder %s780_s24, %s780_s24 }
   0x8   :  { %p787_p3 = por %p786_p2, %p785_p1 }
   0xa   :  { %p788_p4 = pnand %p787_p3, %p781_p0 }
   0xc   :  { %791 = shalt.err (!%p788_p4)
}
   0xd   :  { %s861_s25 = smov [#allocation6]  }
   0xe   :  { %32 = dma.vmem_to_smem %s30_s20, 16, %s861_s25, [#allocation5]  }
   0xf   :  { %852 = dma.done.wait [#allocation4], 16  }
  0x10   :  { %853 = vsyncadd [#allocation4], 4294967280 }
  0x11   :  { %854 = dma.done.wait [#allocation5], 16  }
  0x12   :  { %855 = vsyncadd [#allocation5], 4294967280 }
  0x13   :  { %41 = sfence }
  0x14   :  { %s902_s1 = sld [smem:[#allocation2 + $0x2]]  ;;  %v50_v0 = vlaneseq  ;;  %v49_v1 = vld [vmem:[%s1420_s2] sm:$0x1]  ;;  %vm211_vm2 = vcmask 1040384   ;;  %v1424_v10 = vmov 0.0  }
  0x15   :  { %s46_s26 = sld [smem:[#allocation6]] }
  0x16   :  { %s721_s0 = sld [smem:[#allocation6 + $0x1]]  ;;  %v907_v2 = vand.u32 127, %v50_v0  ;;  %v909_v3 = vshrl.u32 %v50_v0, 7 }
  0x17   :  { %s912_s29 = sld [smem:[#allocation2]] }
  0x18   :  { %s718_s30 = sld [smem:[#allocation2 + $0x1]]  ;;  %v916_v9 = vsub.s32 0, %v909_v3  ;;  %v422_v14 = vmul.u32 2654435, %v907_v2  ;;  %v432_v22 = vmul.u32 97, %v907_v2  ;;  %v941_v40 = vcvt.s32.f32 %v907_v2 }
  0x19   :  { %v963_v50 = vadd.s32 8, %v909_v3  ;;  %v969_v52 = vadd.s32 16, %v909_v3  ;;  %v974_v53 = vadd.s32 24, %v909_v3  ;;  %vm251_vm6 = vcmp.le.s32.totalorder %v909_v3, %v907_v2  ;;  %s722_s25 = sld [smem:[#allocation6 + $0x2]] }
  0x1a   :  { %v201_v4 = vstv %s902_s1  ;;  %s108_s8 = smul.u32 31, %s902_s1  ;;  %v74_v25 = vrot.slane %v49_v1, %v916_v9  ;;  %v984_v55 = vadd.s32 32, %v909_v3  ;;  %v990_v57 = vadd.s32 40, %v909_v3 }
  0x1b   :  { %v203_v5 = vstv %s46_s26  ;;  %vm202_vm0 = vcmp.lt.s32.totalorder %v907_v2, %v201_v4  ;;  %vm252_vm5 = vcmp.le.s32.totalorder %v963_v50, %v907_v2  ;;  %vm253_vm7 = vcmp.le.s32.totalorder %v969_v52, %v907_v2 }
  0x1c   :  { %v204_v6 = vsub.f32 %v49_v1, %v203_v5  ;;  %v206_v7 = vstv %s721_s0  ;;  %vm254_vm8 = vcmp.le.s32.totalorder %v974_v53, %v907_v2  ;;  %vm255_vm9 = vcmp.le.s32.totalorder %v984_v55, %v907_v2  ;;  %s864_s0 = smov [#allocation10]  }
  0x1d   :  { %s115_s2 = ssub.s32 %s902_s1, %s912_s29  ;;  %s110_s10 = smul.u32 7, %s912_s29  ;;  %v1000_v62 = vadd.s32 48, %v909_v3  ;;  %vm256_vm10 = vcmp.le.s32.totalorder %v990_v57, %v907_v2  ;;  %v1006_v1 = vadd.s32 56, %v909_v3 }
  0x1e   :  { %v205_v8 = vand.u32 2147483647, %v204_v6  ;;  %s423_s6 = smul.u32 40503, %s718_s30  ;;  %s116_s7 = sadd.s32 1, %s115_s2 }
  0x1f   :  { %p117_p5 = scmp.eq.s32.totalorder %s116_s7, 0  ;;  %s109_s9 = sadd.s32 %s718_s30, %s108_s8  ;;  %vm257_vm11 = vcmp.le.s32.totalorder %v1000_v62, %v907_v2  ;;  %vm258_vm12 = vcmp.le.s32.totalorder %v1006_v1, %v907_v2 }
  0x20   :  { %vm207_vm1 = vcmp.le.f32.partialorder %v205_v8, %v206_v7  ;;  %v424_v15 = vstv %s423_s6  ;;  %s111_s11 = sadd.s32 %s110_s10, %s109_s9  ;;  %v1015_v7 = vadd.s32 64, %v909_v3  ;;  %s863_s1 = smov [#allocation8]  }
  0x21   :  { %vm208_vm3 = vmand %vm202_vm0, %vm207_vm1  ;;  %v425_v16 = vadd.s32 %v424_v15, %v422_v14  ;;  %s1457_s7 = smov (%p117_p5, %s116_s7), 1  ;;  %s112_s12 = smul.u32 1103515245, %s111_s11  ;;  %v1030_v15 = vadd.s32 80, %v909_v3 }
  0x22   :  { %v728_v11 = vsel %vm208_vm3, 1.0, %v1424_v10  ;;  %s123_s13 = ssub.s32 0, %s1457_s7  ;;  %vm259_vm13 = vcmp.le.s32.totalorder %v1015_v7, %v907_v2  ;;  %p131_p7 = scmp.lt.s32.totalorder %s1457_s7, 0 }
  0x23   :  { %v212_v12 = vsel %vm211_vm2, %v728_v11, 0.0  ;;  %v218_v13 = vrot.slane %v728_v11, %v916_v9  ;;  %v426_v17 = vadd.s32 1013, %v425_v16  ;;  %s113_s14 = sadd.s32 12345, %s112_s12  ;;  %s724_s16 = smin.u32 %s123_s13, %s1457_s7  ;;  %v436_v26 = vadd.s32 1990, %v425_v16 }
  0x24   :  { %213 = vadd.xlane.f32.xlu0 %v212_v12  ;;  %s114_s15 = sand.u32 2147483647, %s113_s14  ;;  %v1021_v11 = vadd.s32 72, %v909_v3  ;;  %vm261_vm15 = vcmp.le.s32.totalorder %v1030_v15, %v907_v2  ;;  %p726_p9 = scmp.ge.s32.totalorder %s1457_s7, 0 }
  0x25   :  { %219 = vxpose.xlu1.b32.start [1/16] %v218_v13, 128  ;;  %v427_v18 = vmul.u32 1103515245, %v426_v17  ;;  %s120_s17 = ssub.s32 0, %s114_s15  ;;  %v437_v27 = vmul.u32 1103515245, %v436_v26  ;;  %s691_s26 = sshll.u32 %s863_s1, 4  ;;  %s692_s26 = int_to_ptr.vmem [resolvable:$true] %s691_s26 }
  0x26   :  { %s723_s18 = smin.u32 %s120_s17, %s114_s15  ;;  %vm260_vm14 = vcmp.le.s32.totalorder %v1021_v11, %v907_v2  ;;  %s701_s27 = sshll.u32 %s864_s0, 4  ;;  %s702_s27 = int_to_ptr.vmem [resolvable:$true] %s701_s27 }
  0x27   :  { %v428_v19 = vadd.s32 12345, %v427_v18  ;;  %770 = sdivrem.u32 %s723_s18, %s724_s16  ;;  %v438_v28 = vadd.s32 12345, %v437_v27  ;;  %v1036_v18 = vadd.s32 88, %v909_v3  ;;  %v1053_v27 = vadd.s32 104, %v909_v3  ;;  %s792_s28 = scalar_lea.vmem %s692_s26, 16 }
  0x28   :  { %p793_p3 = scmp.ne.s32.totalorder %s692_s26, %s792_s28  ;;  %p797_p4 = scmp.lt.s32.totalorder %s692_s26, %s692_s26 }
  0x29   :  { %220 = vxpose.xlu1.b32.cont [2/16] %v218_v13, 128  ;;  %v429_v20 = vand.u32 2147483647, %v428_v19  ;;  %v439_v29 = vand.u32 2147483647, %v438_v28  ;;  %1435 = vst [vmem:[#allocation15_spill] sm:$0xff] %v1036_v18  ;;  %vm262_vm0 = vcmp.le.s32.totalorder %v1036_v18, %v907_v2  ;;  %1437 = vst [vmem:[#allocation17_spill] sm:$0xff] %v1053_v27  ;;  %vm264_vm2 = vcmp.le.s32.totalorder %v1053_v27, %v907_v2 }
  0x2b   :  { %v430_v21 = vmul.u32 214013, %v429_v20  ;;  %v440_v30 = vmul.u32 214013, %v439_v29 }
  0x2d   :  { %221 = vxpose.xlu1.b32.cont [3/16] %v218_v13, 128  ;;  %v431_v23 = vadd.s32 2531011, %v430_v21  ;;  %v441_v31 = vadd.s32 2531011, %v440_v30  ;;  %v1060_v30 = vadd.s32 112, %v909_v3 }
  0x2f   :  { %v930_v24 = vadd.s32 %v432_v22, %v431_v23  ;;  %v442_v32 = vadd.s32 %v441_v31, %v432_v22  ;;  %v1045_v22 = vadd.s32 96, %v909_v3  ;;  %1438 = vst [vmem:[#allocation18_spill] sm:$0xff] %v1060_v30  ;;  %vm265_vm3 = vcmp.le.s32.totalorder %v1060_v30, %v907_v2 }
  0x30   :  { %s1171_s19 = spop.drf %770 }
  0x31   :  { %222 = vxpose.xlu1.b32.cont [4/16] %v218_v13, 128  ;;  %v443_v33 = vand.u32 2147483647, %v442_v32  ;;  %1436 = vst [vmem:[#allocation16_spill] sm:$0xff] %v1045_v22  ;;  %vm263_vm1 = vcmp.le.s32.totalorder %v1045_v22, %v907_v2  ;;  %p130_p6 = scmp.lt.s32.totalorder %s1171_s19, 0  ;;  %p725_p8 = scmp.ge.s32.totalorder %s1171_s19, 0 }
  0x32   :  { %p129_p0 = scmp.ne.s32.totalorder %s1171_s19, 0  ;;  %s141_s24 = sadd.s32 %s1171_s19, %s1457_s7 }
  0x33   :  { %v444_v34 = vand.u32 131071, %v443_v33  ;;  %p1214_p10 = pnand %p726_p9, %p130_p6  ;;  %p1222_p11 = pnand %p725_p8, %p131_p7 }
  0x35   :  { %223 = vxpose.xlu1.b32.cont [5/16] %v218_v13, 128  ;;  %v559_v36 = vmul.u32 128, %v444_v34  ;;  %p135_p12 = pneg %p1214_p10  ;;  %p137_p13 = pneg %p1222_p11 }
  0x37   :  { %v560_v38 = vadd.s32 %v559_v36, %v907_v2  ;;  %p1255_p1 = por %p137_p13, %p135_p12 }
  0x39   :  { %224 = vxpose.xlu1.b32.cont [6/16] %v218_v13, 128  ;;  %v561_v41 = vcvt.s32.f32 %v560_v38  ;;  %p1271_p2 = pnand %p1255_p1, %p129_p0 }
  0x3b   :  { %s1459_s19 = smov (!%p1271_p2, %s1171_s19), %s141_s24 }
  0x3d   :  { %225 = vxpose.xlu1.b32.cont [7/16] %v218_v13, 128 }
  0x41   :  { %226 = vxpose.xlu1.b32.cont [8/16] %v218_v13, 128 }
  0x45   :  { %227 = vxpose.xlu1.b32.cont [9/16] %v218_v13, 128 }
  0x49   :  { %228 = vxpose.xlu1.b32.cont [10/16] %v218_v13, 128 }
  0x4d   :  { %229 = vxpose.xlu1.b32.cont [11/16] %v218_v13, 128 }
  0x51   :  { %230 = vxpose.xlu1.b32.cont [12/16] %v218_v13, 128  ;;  %76 = vxpose.xlu0.b32.start [1/16] %v74_v25, 128 }
  0x55   :  { %231 = vxpose.xlu1.b32.cont [13/16] %v218_v13, 128  ;;  %77 = vxpose.xlu0.b32.cont [2/16] %v74_v25, 128 }
  0x59   :  { %232 = vxpose.xlu1.b32.cont [14/16] %v218_v13, 128  ;;  %78 = vxpose.xlu0.b32.cont [3/16] %v74_v25, 128 }
  0x5d   :  { %233 = vxpose.xlu1.b32.cont [15/16] %v218_v13, 128  ;;  %79 = vxpose.xlu0.b32.cont [4/16] %v74_v25, 128 }
  0x61   :  { %234 = vxpose.xlu1.b32.end [16/16] %v218_v13, 128  ;;  %80 = vxpose.xlu0.b32.cont [5/16] %v74_v25, 128 }
  0x65   :  { %81 = vxpose.xlu0.b32.cont [6/16] %v74_v25, 128 }
  0x69   :  { %82 = vxpose.xlu0.b32.cont [7/16] %v74_v25, 128 }
  0x6d   :  { %83 = vxpose.xlu0.b32.cont [8/16] %v74_v25, 128 }
  0x71   :  { %84 = vxpose.xlu0.b32.cont [9/16] %v74_v25, 128 }
  0x75   :  { %85 = vxpose.xlu0.b32.cont [10/16] %v74_v25, 128 }
  0x79   :  { %86 = vxpose.xlu0.b32.cont [11/16] %v74_v25, 128 }
  0x7d   :  { %87 = vxpose.xlu0.b32.cont [12/16] %v74_v25, 128 }
  0x81   :  { %88 = vxpose.xlu0.b32.cont [13/16] %v74_v25, 128 }
  0x85   :  { %89 = vxpose.xlu0.b32.cont [14/16] %v74_v25, 128 }
  0x89   :  { %90 = vxpose.xlu0.b32.cont [15/16] %v74_v25, 128 }
  0x8d   :  { %91 = vxpose.xlu0.b32.end [16/16] %v74_v25, 128 }
  0xa1   :  { %v933_v35 = vpop.trf.xlu1 }
  0xa2   :  { %v267_v59 = vsel %vm251_vm6, %v933_v35, 0.0 }
  0xa5   :  { %v935_v37 = vpop.trf.xlu1 }
  0xa6   :  { %v268_v56 = vsel %vm252_vm5, %v935_v37, 0.0 }
  0xa7   :  { %v283_v61 = vadd.f32 %v268_v56, %v267_v59 }
  0xa9   :  { %v938_v39 = vpop.trf.xlu1 }
  0xaa   :  { %v269_v60 = vsel %vm253_vm7, %v938_v39, 0.0 }
  0xab   :  { %v284_v0 = vadd.f32 %v283_v61, %v269_v60 }
  0xad   :  { %v943_v42 = vpop.trf.xlu1  ;;  %v945_v43 = vpop.xlane.xlu0 %213 }
  0xae   :  { %vm449_vm4 = vcmp.lt.f32.partialorder %v941_v40, %v945_v43  ;;  %v762_v45 = vtrunc.f32 %v945_v43  ;;  %v270_v63 = vsel %vm254_vm8, %v943_v42, 0.0  ;;  %vm353_vm8 = vcmp.gt.f32.partialorder %v933_v35, 0.5 }
  0xaf   :  { %v562_v44 = vsel %vm449_vm4, %v561_v41, 33554432.0  ;;  %v285_v6 = vadd.f32 %v284_v0, %v270_v63  ;;  %v1074_v41 = vadd.s32 120, %v909_v3 }
  0xb0   :  { %v954_v46 = vrot.slane %v562_v44, %v916_v9  ;;  %v763_v48 = vcvt.f32.s32 %v762_v45 }
  0xb1   :  { %v956_v47 = vpop.trf.xlu1  ;;  %1439 = vst [vmem:[#allocation19_spill] sm:$0xff] %v1074_v41  ;;  %vm266_vm5 = vcmp.le.s32.totalorder %v1074_v41, %v907_v2 }
  0xb2   :  { %567 = vxpose.xlu0.b32.start [1/16] %v954_v46, 128  ;;  %674 = vst [vmem:[#allocation10] sm:$0x1] %v763_v48  ;;  %v271_v5 = vsel %vm255_vm9, %v956_v47, 0.0 }
  0xb3   :  { %v286_v9 = vadd.f32 %v285_v6, %v271_v5 }
  0xb5   :  { %v959_v49 = vpop.trf.xlu1 }
  0xb6   :  { %568 = vxpose.xlu0.b32.cont [2/16] %v954_v46, 128  ;;  %v272_v8 = vsel %vm256_vm10, %v959_v49, 0.0  ;;  %vm354_vm10 = vcmp.gt.f32.partialorder %v935_v37, 0.5 }
  0xb7   :  { %v287_v14 = vadd.f32 %v286_v9, %v272_v8 }
  0xb9   :  { %v965_v51 = vpop.trf.xlu1 }
  0xba   :  { %569 = vxpose.xlu0.b32.cont [3/16] %v954_v46, 128  ;;  %v273_v13 = vsel %vm257_vm11, %v965_v51, 0.0 }
  0xbb   :  { %v288_v17 = vadd.f32 %v287_v14, %v273_v13 }
  0xbd   :  { %v976_v54 = vpop.trf.xlu1 }
  0xbe   :  { %570 = vxpose.xlu0.b32.cont [4/16] %v954_v46, 128  ;;  %v274_v16 = vsel %vm258_vm12, %v976_v54, 0.0 }
  0xbf   :  { %v289_v21 = vadd.f32 %v288_v17, %v274_v16 }
  0xc1   :  { %v992_v58 = vpop.trf.xlu1 }
  0xc2   :  { %571 = vxpose.xlu0.b32.cont [5/16] %v954_v46, 128  ;;  %v275_v20 = vsel %vm259_vm13, %v992_v58, 0.0  ;;  %vm355_vm13 = vcmp.gt.f32.partialorder %v938_v39, 0.5  ;;  %v1444_v39 = vmov 0.0  }
  0xc3   :  { %v290_v25 = vadd.f32 %v289_v21, %v275_v20 }
  0xc5   :  { %v1008_v4 = vpop.trf.xlu1 }
  0xc6   :  { %572 = vxpose.xlu0.b32.cont [6/16] %v954_v46, 128  ;;  %v276_v23 = vsel %vm260_vm14, %v1008_v4, 0.0 }
  0xc7   :  { %v291_v29 = vadd.f32 %v290_v25, %v276_v23 }
  0xc9   :  { %v1023_v12 = vpop.trf.xlu1 }
  0xca   :  { %573 = vxpose.xlu0.b32.cont [7/16] %v954_v46, 128  ;;  %v277_v28 = vsel %vm261_vm15, %v1023_v12, 0.0 }
  0xcb   :  { %v292_v32 = vadd.f32 %v291_v29, %v277_v28 }
  0xcd   :  { %v1038_v19 = vpop.trf.xlu1  ;;  %v1069_v36 = vpop.trf.xlu0 }
  0xce   :  { %574 = vxpose.xlu0.b32.cont [8/16] %v954_v46, 128  ;;  %v278_v31 = vsel %vm262_vm0, %v1038_v19, 0.0 }
  0xcf   :  { %v293_v38 = vadd.f32 %v292_v32, %v278_v31 }
  0xd1   :  { %v1050_v26 = vpop.trf.xlu1  ;;  %v1083_v60 = vpop.trf.xlu0 }
  0xd2   :  { %575 = vxpose.xlu0.b32.cont [9/16] %v954_v46, 128  ;;  %v279_v34 = vsel %vm263_vm1, %v1050_v26, 0.0  ;;  %vm356_vm1 = vcmp.gt.f32.partialorder %v943_v42, 0.5 }
  0xd3   :  { %v294_v45 = vadd.f32 %v293_v38, %v279_v34  ;;  %v434_v38 = vand.u32 2147483647, %v930_v24 }
  0xd5   :  { %v1065_v33 = vpop.trf.xlu1  ;;  %v1090_v8 = vpop.trf.xlu0 }
  0xd6   :  { %576 = vxpose.xlu0.b32.cont [10/16] %v954_v46, 128  ;;  %v280_v44 = vsel %vm264_vm2, %v1065_v33, 0.0 }
  0xd7   :  { %v295_v59 = vadd.f32 %v294_v45, %v280_v44  ;;  %v435_v45 = vand.u32 131071, %v434_v38 }
  0xd9   :  { %v1077_v48 = vpop.trf.xlu1  ;;  %v1093_v16 = vpop.trf.xlu0 }
  0xda   :  { %v281_v56 = vsel %vm265_vm3, %v1077_v48, 0.0  ;;  %577 = vxpose.xlu0.b32.cont [11/16] %v954_v46, 128 }
  0xdb   :  { %v296_v61 = vadd.f32 %v295_v59, %v281_v56  ;;  %v450_v59 = vmul.u32 128, %v435_v45 }
  0xdd   :  { %v1085_v63 = vpop.trf.xlu1  ;;  %v1097_v23 = vpop.trf.xlu0 }
  0xde   :  { %v282_v0 = vsel %vm266_vm5, %v1085_v63, 0.0  ;;  %578 = vxpose.xlu0.b32.cont [12/16] %v954_v46, 128 }
  0xdf   :  { %v297_v5 = vadd.f32 %v296_v61, %v282_v0  ;;  %v451_v61 = vadd.s32 %v450_v59, %v907_v2 }
  0xe1   :  { %v298_v6 = vrot.slane %v297_v5, 4  ;;  %v1099_v25 = vpop.trf.xlu0 }
  0xe2   :  { %579 = vxpose.xlu0.b32.cont [13/16] %v954_v46, 128 }
  0xe3   :  { %v299_v9 = vadd.f32 %v298_v6, %v297_v5  ;;  %v198_v5 = vstv %s912_s29  ;;  %v452_v6 = vcvt.s32.f32 %v451_v61  ;;  %s796_s29 = scalar_lea.vmem %s692_s26, 32 }
  0xe4   :  { %vm1121_vm6 = vcmp.lt.s32.totalorder %v907_v2, %v198_v5  ;;  %p798_p5 = scmp.lt.s32.totalorder %s796_s29, %s792_s28 }
  0xe5   :  { %v300_v13 = vrot.slane %v299_v9, 2  ;;  %v1101_v28 = vpop.trf.xlu0 }
  0xe6   :  { %580 = vxpose.xlu0.b32.cont [14/16] %v954_v46, 128  ;;  %p799_p6 = por %p798_p5, %p797_p4 }
  0xe7   :  { %v301_v14 = vadd.f32 %v300_v13, %v299_v9  ;;  %v1440_v9 = vmov 0  ;;  %v1129_v13 = vsel %vm1121_vm6, %v452_v6, 33554432.0 }
  0xe8   :  { %v1441_v9 = vsel %vm1121_vm6, 4294967295, %v1440_v9  ;;  %1443 = vst [vmem:[#allocation21_spill] sm:$0xff] %v1129_v13  ;;  %p800_p7 = pnand %p799_p6, %p793_p3 }
  0xe9   :  { %v302_v17 = vrot.slane %v301_v14, 1  ;;  %v1103_v29 = vpop.trf.xlu0  ;;  %1442 = vst [vmem:[#allocation20_spill] sm:$0xff] %v1441_v9 }
  0xea   :  { %581 = vxpose.xlu0.b32.cont [15/16] %v954_v46, 128 }
  0xeb   :  { %v303_v20 = vadd.f32 %v302_v17, %v301_v14 }
  0xed   :  { %v729_v21 = vadd.f32 -1.0, %v303_v20  ;;  %v1105_v31 = vpop.trf.xlu0 }
  0xee   :  { %582 = vxpose.xlu0.b32.end [16/16] %v954_v46, 128 }
  0xef   :  { %305 = vxpose.xlu1.b32.start [1/16] %v729_v21, 128 }
  0xf1   :  { %v1107_v32 = vpop.trf.xlu0 }
  0xf3   :  { %306 = vxpose.xlu1.b32.cont [2/16] %v729_v21, 128 }
  0xf5   :  { %v1109_v34 = vpop.trf.xlu0 }
  0xf7   :  { %307 = vxpose.xlu1.b32.cont [3/16] %v729_v21, 128 }
  0xf9   :  { %v1112_v44 = vpop.trf.xlu0 }
  0xfb   :  { %308 = vxpose.xlu1.b32.cont [4/16] %v729_v21, 128 }
  0xfd   :  { %v1114_v56 = vpop.trf.xlu0 }
  0xff   :  { %309 = vxpose.xlu1.b32.cont [5/16] %v729_v21, 128 }
 0x101   :  { %v1117_v0 = vpop.trf.xlu0 }
 0x103   :  { %310 = vxpose.xlu1.b32.cont [6/16] %v729_v21, 128 }
 0x105   :  { %v1125_v24 = vpop.trf.xlu0 }
 0x107   :  { %311 = vxpose.xlu1.b32.cont [7/16] %v729_v21, 128 }
 0x109   :  { %v1132_v14 = vpop.trf.xlu0 }
 0x10b   :  { %312 = vxpose.xlu1.b32.cont [8/16] %v729_v21, 128 }
 0x10f   :  { %313 = vxpose.xlu1.b32.cont [9/16] %v729_v21, 128 }
 0x113   :  { %314 = vxpose.xlu1.b32.cont [10/16] %v729_v21, 128 }
 0x117   :  { %315 = vxpose.xlu1.b32.cont [11/16] %v729_v21, 128 }
 0x11b   :  { %316 = vxpose.xlu1.b32.cont [12/16] %v729_v21, 128 }
 0x11f   :  { %317 = vxpose.xlu1.b32.cont [13/16] %v729_v21, 128 }
 0x123   :  { %318 = vxpose.xlu1.b32.cont [14/16] %v729_v21, 128 }
 0x127   :  { %319 = vxpose.xlu1.b32.cont [15/16] %v729_v21, 128 }
 0x12b   :  { %320 = vxpose.xlu1.b32.end [16/16] %v729_v21, 128 }
 0x12e   :  { %v583_v17 = vpop.trf.xlu0 }
 0x12f   :  { %454 = vxpose.xlu1.b32.start [1/16] %v1129_v13, 128  ;;  %vm599_vm3 = vcmp.lt.f32.partialorder %v583_v17, %v954_v46 }
 0x130   :  { %v746_v42 = vsel %vm599_vm3, 1.0, %v1444_v39  ;;  %vm359_vm3 = vcmp.gt.f32.partialorder %v965_v51, 0.5 }
 0x132   :  { %v584_v20 = vpop.trf.xlu0 }
 0x133   :  { %455 = vxpose.xlu1.b32.cont [2/16] %v1129_v13, 128  ;;  %vm600_vm0 = vcmp.lt.f32.partialorder %v584_v20, %v954_v46 }
 0x136   :  { %v585_v38 = vpop.trf.xlu0 }
 0x137   :  { %456 = vxpose.xlu1.b32.cont [3/16] %v1129_v13, 128  ;;  %vm601_vm5 = vcmp.lt.f32.partialorder %v585_v38, %v954_v46 }
 0x138   :  { %v748_v17 = vsel %vm601_vm5, 1.0, %v1444_v39 }
 0x13a   :  { %v586_v21 = vpop.trf.xlu0 }
 0x13b   :  { %457 = vxpose.xlu1.b32.cont [4/16] %v1129_v13, 128 }
 0x13e   :  { %v1141_v45 = vpop.trf.xlu0 }
 0x13f   :  { %458 = vxpose.xlu1.b32.cont [5/16] %v1129_v13, 128 }
 0x142   :  { %v1145_v59 = vpop.trf.xlu0 }
 0x143   :  { %459 = vxpose.xlu1.b32.cont [6/16] %v1129_v13, 128 }
 0x146   :  { %v1148_v61 = vpop.trf.xlu0 }
 0x147   :  { %460 = vxpose.xlu1.b32.cont [7/16] %v1129_v13, 128 }
 0x14a   :  { %v1152_v5 = vpop.trf.xlu0 }
 0x14b   :  { %461 = vxpose.xlu1.b32.cont [8/16] %v1129_v13, 128 }
 0x14e   :  { %v1155_v6 = vpop.trf.xlu0 }
 0x14f   :  { %462 = vxpose.xlu1.b32.cont [9/16] %v1129_v13, 128 }
 0x152   :  { %v1159_v9 = vpop.trf.xlu0 }
 0x153   :  { %463 = vxpose.xlu1.b32.cont [10/16] %v1129_v13, 128 }
 0x156   :  { %v1165_v30 = vpop.trf.xlu0 }
 0x157   :  { %464 = vxpose.xlu1.b32.cont [11/16] %v1129_v13, 128 }
 0x15b   :  { %465 = vxpose.xlu1.b32.cont [12/16] %v1129_v13, 128 }
 0x15f   :  { %466 = vxpose.xlu1.b32.cont [13/16] %v1129_v13, 128 }
 0x163   :  { %467 = vxpose.xlu1.b32.cont [14/16] %v1129_v13, 128 }
 0x167   :  { %468 = vxpose.xlu1.b32.cont [15/16] %v1129_v13, 128 }
 0x16b   :  { %v321_v10 = vpop.trf.xlu1  ;;  %469 = vxpose.xlu1.b32.end [16/16] %v1129_v13, 128 }
 0x16c   :  { %vm337_vm7 = vcmp.eq.f32.partialorder %v321_v10, %v941_v40 }
 0x16d   :  { %vm369_vm9 = vmand %vm337_vm7, %vm353_vm8  ;;  %vm602_vm8 = vcmp.lt.f32.partialorder %v586_v21, %v954_v46 }
 0x16e   :  { %v385_v27 = vsel %vm369_vm9, %v1069_v36, 0.0  ;;  %vm357_vm9 = vcmp.gt.f32.partialorder %v956_v47, 0.5  ;;  %v749_v38 = vsel %vm602_vm8, 1.0, %v1444_v39 }
 0x16f   :  { %v322_v41 = vpop.trf.xlu1 }
 0x170   :  { %vm338_vm11 = vcmp.eq.f32.partialorder %v322_v41, %v941_v40  ;;  %v1176_v41 = vpop.trf.xlu0 }
 0x171   :  { %vm370_vm12 = vmand %vm338_vm11, %vm354_vm10  ;;  %vm603_vm11 = vcmp.lt.f32.partialorder %v1141_v45, %v954_v46 }
 0x172   :  { %v386_v22 = vsel %vm370_vm12, %v1083_v60, 0.0  ;;  %v750_v45 = vsel %vm603_vm11, 1.0, %v1444_v39 }
 0x173   :  { %v401_v13 = vadd.f32 %v386_v22, %v385_v27  ;;  %v323_v18 = vpop.trf.xlu1 }
 0x174   :  { %vm339_vm14 = vcmp.eq.f32.partialorder %v323_v18, %v941_v40  ;;  %v747_v18 = vsel %vm600_vm0, 1.0, %v1444_v39  ;;  %v1191_v21 = vpop.trf.xlu0  ;;  %vm605_vm0 = vcmp.lt.f32.partialorder %v1148_v61, %v954_v46 }
 0x175   :  { %vm371_vm15 = vmand %vm339_vm14, %vm355_vm13  ;;  %v647_v20 = vadd.f32 %v747_v18, %v746_v42  ;;  %vm604_vm13 = vcmp.lt.f32.partialorder %v1145_v59, %v954_v46  ;;  %vm358_vm14 = vcmp.gt.f32.partialorder %v959_v49, 0.5  ;;  %v752_v61 = vsel %vm605_vm0, 1.0, %v1444_v39 }
 0x176   :  { %v387_v10 = vsel %vm371_vm15, %v1090_v8, 0.0  ;;  %v751_v59 = vsel %vm604_vm13, 1.0, %v1444_v39 }
 0x177   :  { %v402_v35 = vadd.f32 %v401_v13, %v387_v10  ;;  %v324_v37 = vpop.trf.xlu1  ;;  %v648_v47 = vadd.f32 %v748_v17, %v647_v20 }
 0x178   :  { %vm340_vm2 = vcmp.eq.f32.partialorder %v324_v37, %v941_v40 }
 0x179   :  { %vm372_vm7 = vmand %vm340_vm2, %vm356_vm1  ;;  %v649_v18 = vadd.f32 %v749_v38, %v648_v47  ;;  %vm606_vm2 = vcmp.lt.f32.partialorder %v1152_v5, %v954_v46  ;;  %v596_v5 = vpop.trf.xlu0 }
 0x17a   :  { %v388_v22 = vsel %vm372_vm7, %v1093_v16, 0.0  ;;  %vm607_vm7 = vcmp.lt.f32.partialorder %v1155_v6, %v954_v46  ;;  %v753_v42 = vsel %vm606_vm2, 1.0, %v1444_v39 }
 0x17b   :  { %v403_v27 = vadd.f32 %v402_v35, %v388_v22  ;;  %v325_v13 = vpop.trf.xlu1  ;;  %v754_v6 = vsel %vm607_vm7, 1.0, %v1444_v39 }
 0x17c   :  { %vm341_vm10 = vcmp.eq.f32.partialorder %v325_v13, %v941_v40 }
 0x17d   :  { %vm373_vm12 = vmand %vm341_vm10, %vm357_vm9  ;;  %vm608_vm9 = vcmp.lt.f32.partialorder %v1159_v9, %v954_v46  ;;  %vm360_vm10 = vcmp.gt.f32.partialorder %v976_v54, 0.5 }
 0x17e   :  { %v389_v10 = vsel %vm373_vm12, %v1097_v23, 0.0  ;;  %vm609_vm12 = vcmp.lt.f32.partialorder %v1165_v30, %v954_v46  ;;  %v755_v9 = vsel %vm608_vm9, 1.0, %v1444_v39 }
 0x17f   :  { %v404_v35 = vadd.f32 %v403_v27, %v389_v10  ;;  %v326_v37 = vpop.trf.xlu1  ;;  %v650_v27 = vadd.f32 %v750_v45, %v649_v18  ;;  %v756_v30 = vsel %vm609_vm12, 1.0, %v1444_v39 }
 0x180   :  { %vm342_vm15 = vcmp.eq.f32.partialorder %v326_v37, %v941_v40 }
 0x181   :  { %vm374_vm1 = vmand %vm342_vm15, %vm358_vm14  ;;  %v651_v51 = vadd.f32 %v751_v59, %v650_v27  ;;  %vm610_vm14 = vcmp.lt.f32.partialorder %v1176_v41, %v954_v46  ;;  %vm361_vm15 = vcmp.gt.f32.partialorder %v992_v58, 0.5 }
 0x182   :  { %v390_v22 = vsel %vm374_vm1, %v1099_v25, 0.0  ;;  %vm611_vm1 = vcmp.lt.f32.partialorder %v1191_v21, %v954_v46  ;;  %v757_v58 = vsel %vm610_vm14, 1.0, %v1444_v39  ;;  %vm364_vm14 = vcmp.gt.f32.partialorder %v1038_v19, 0.5 }
 0x183   :  { %v405_v49 = vadd.f32 %v404_v35, %v390_v22  ;;  %v327_v13 = vpop.trf.xlu1  ;;  %v652_v20 = vadd.f32 %v752_v61, %v651_v51  ;;  %v597_v35 = vpop.trf.xlu0  ;;  %v758_v21 = vsel %vm611_vm1, 1.0, %v1444_v39  ;;  %vm365_vm1 = vcmp.gt.f32.partialorder %v1050_v26, 0.5 }
 0x184   :  { %vm343_vm5 = vcmp.eq.f32.partialorder %v327_v13, %v941_v40 }
 0x185   :  { %vm375_vm8 = vmand %vm343_vm5, %vm359_vm3  ;;  %v653_v47 = vadd.f32 %v753_v42, %v652_v20  ;;  %vm612_vm3 = vcmp.lt.f32.partialorder %v596_v5, %v954_v46  ;;  %vm362_vm5 = vcmp.gt.f32.partialorder %v1008_v4, 0.5 }
 0x186   :  { %v391_v17 = vsel %vm375_vm8, %v1101_v28, 0.0  ;;  %vm613_vm8 = vcmp.lt.f32.partialorder %v597_v35, %v954_v46  ;;  %v759_v4 = vsel %vm612_vm3, 1.0, %v1444_v39 }
 0x187   :  { %v406_v38 = vadd.f32 %v405_v49, %v391_v17  ;;  %v328_v10 = vpop.trf.xlu1  ;;  %v654_v37 = vadd.f32 %v754_v6, %v653_v47  ;;  %v598_v13 = vpop.trf.xlu0  ;;  %v760_v20 = vsel %vm613_vm8, 1.0, %v1444_v39  ;;  %vm366_vm8 = vcmp.gt.f32.partialorder %v1065_v33, 0.5 }
 0x188   :  { %vm344_vm11 = vcmp.eq.f32.partialorder %v328_v10, %v941_v40 }
 0x189   :  { %vm376_vm13 = vmand %vm344_vm11, %vm360_vm10  ;;  %v655_v41 = vadd.f32 %v755_v9, %v654_v37  ;;  %vm614_vm10 = vcmp.lt.f32.partialorder %v598_v13, %v954_v46  ;;  %vm363_vm11 = vcmp.gt.f32.partialorder %v1023_v12, 0.5  ;;  %v143_v46 = vstv %s1459_s19 }
 0x18a   :  { %v392_v54 = vsel %vm376_vm13, %v1103_v29, 0.0  ;;  %v761_v10 = vsel %vm614_vm10, 1.0, %v1444_v39  ;;  %v1295_v37 = vadd.s32 %v143_v46, %v907_v2 }
 0x18b   :  { %v407_v45 = vadd.f32 %v406_v38, %v392_v54  ;;  %v329_v18 = vpop.trf.xlu1  ;;  %v656_v22 = vadd.f32 %v756_v30, %v655_v41 }
 0x18c   :  { %vm345_vm0 = vcmp.eq.f32.partialorder %v329_v18, %v941_v40 }
 0x18d   :  { %vm377_vm2 = vmand %vm345_vm0, %vm361_vm15  ;;  %v657_v61 = vadd.f32 %v757_v58, %v656_v22 }
 0x18e   :  { %v393_v59 = vsel %vm377_vm2, %v1105_v31, 0.0 }
 0x18f   :  { %v408_v27 = vadd.f32 %v407_v45, %v393_v59  ;;  %v330_v49 = vpop.trf.xlu1  ;;  %v658_v51 = vadd.f32 %v758_v21, %v657_v61 }
 0x190   :  { %vm346_vm7 = vcmp.eq.f32.partialorder %v330_v49, %v941_v40 }
 0x191   :  { %vm378_vm9 = vmand %vm346_vm7, %vm362_vm5  ;;  %v659_v38 = vadd.f32 %v759_v4, %v658_v51  ;;  %vm145_vm5 = vcmp.eq.s32.totalorder %v909_v3, %v1295_v37  ;;  %vm146_vm7 = vcmp.eq.s32.totalorder %v963_v50, %v1295_v37 }
 0x192   :  { %v394_v5 = vsel %vm378_vm9, %v1107_v32, 0.0  ;;  %v161_v26 = vsel %vm145_vm5, %v1069_v36, 0.0  ;;  %v162_v59 = vsel %vm146_vm7, %v1083_v60, 0.0  ;;  %vm150_vm5 = vcmp.eq.s32.totalorder %v990_v57, %v1295_v37 }
 0x193   :  { %v409_v42 = vadd.f32 %v408_v27, %v394_v5  ;;  %v331_v17 = vpop.trf.xlu1  ;;  %v660_v47 = vadd.f32 %v760_v20, %v659_v38  ;;  %v177_v50 = vadd.f32 %v162_v59, %v161_v26  ;;  %vm151_vm7 = vcmp.eq.s32.totalorder %v1000_v62, %v1295_v37 }
 0x194   :  { %vm347_vm12 = vcmp.eq.f32.partialorder %v331_v17, %v941_v40  ;;  %v167_v57 = vsel %vm151_vm7, %v1101_v28, 0.0 }
 0x195   :  { %vm379_vm13 = vmand %vm347_vm12, %vm363_vm11  ;;  %v661_v12 = vadd.f32 %v761_v10, %v660_v47  ;;  %vm147_vm11 = vcmp.eq.s32.totalorder %v969_v52, %v1295_v37  ;;  %vm367_vm12 = vcmp.gt.f32.partialorder %v1077_v48, 0.5 }
 0x196   :  { %v395_v6 = vsel %vm379_vm13, %v1109_v34, 0.0  ;;  %v163_v49 = vsel %vm147_vm11, %v1090_v8, 0.0  ;;  %vm153_vm11 = vcmp.eq.s32.totalorder %v1015_v7, %v1295_v37 }
 0x197   :  { %v410_v9 = vadd.f32 %v409_v42, %v395_v6  ;;  %v332_v35 = vpop.trf.xlu1  ;;  %v662_v30 = vrot.slane %v661_v12, 4  ;;  %v178_v52 = vadd.f32 %v177_v50, %v163_v49  ;;  %v166_v6 = vsel %vm150_vm5, %v1099_v25, 0.0 }
 0x198   :  { %vm348_vm15 = vcmp.eq.f32.partialorder %v332_v35, %v941_v40 }
 0x199   :  { %vm380_vm0 = vmand %vm348_vm15, %vm364_vm14  ;;  %v663_v2 = vadd.f32 %v662_v30, %v661_v12  ;;  %vm148_vm15 = vcmp.eq.s32.totalorder %v974_v53, %v1295_v37  ;;  %v446_v53 = vstv %s722_s25 }
 0x19a   :  { %v396_v54 = vsel %vm380_vm0, %v1112_v44, 0.0  ;;  %vm368_vm0 = vcmp.gt.f32.partialorder %v1085_v63, 0.5  ;;  %v164_v13 = vsel %vm148_vm15, %v1093_v16, 0.0  ;;  %v447_v17 = vmul.f32 %v446_v53, %v945_v43 }
 0x19b   :  { %v411_v45 = vadd.f32 %v410_v9, %v396_v54  ;;  %v333_v18 = vpop.trf.xlu1  ;;  %v664_v33 = vrot.slane %v663_v2, 2  ;;  %v179_v5 = vadd.f32 %v178_v52, %v164_v13 }
 0x19c   :  { %vm349_vm2 = vcmp.eq.f32.partialorder %v333_v18, %v941_v40  ;;  %v448_v47 = vfloor.f32 %v447_v17 }
 0x19d   :  { %vm381_vm3 = vmand %vm349_vm2, %vm365_vm1  ;;  %v665_v48 = vadd.f32 %v664_v33, %v663_v2 }
 0x19e   :  { %v397_v19 = vsel %vm381_vm3, %v1114_v56, 0.0  ;;  %vm149_vm3 = vcmp.eq.s32.totalorder %v984_v55, %v1295_v37 }
 0x19f   :  { %v412_v41 = vadd.f32 %v411_v45, %v397_v19  ;;  %v334_v58 = vpop.trf.xlu1  ;;  %v666_v42 = vrot.slane %v665_v48, 1  ;;  %v165_v63 = vsel %vm149_vm3, %v1097_v23, 0.0 }
 0x1a0   :  { %vm350_vm9 = vcmp.eq.f32.partialorder %v334_v58, %v941_v40  ;;  %v180_v38 = vadd.f32 %v179_v5, %v165_v63 }
 0x1a1   :  { %vm382_vm10 = vmand %vm350_vm9, %vm366_vm8  ;;  %v667_v55 = vadd.f32 %v666_v42, %v665_v48  ;;  %vm152_vm9 = vcmp.eq.s32.totalorder %v1006_v1, %v1295_v37 }
 0x1a2   :  { %v398_v22 = vsel %vm382_vm10, %v1117_v0, 0.0  ;;  %v181_v35 = vadd.f32 %v180_v38, %v166_v6  ;;  %v168_v45 = vsel %vm152_vm9, %v1103_v29, 0.0 }
 0x1a3   :  { %v413_v3 = vadd.f32 %v412_v41, %v398_v22  ;;  %v335_v27 = vpop.trf.xlu1  ;;  %vm668_vm8 = vcmp.lt.f32.partialorder %v667_v55, %v448_v47 }
 0x1a4   :  { %vm351_vm13 = vcmp.eq.f32.partialorder %v335_v27, %v941_v40  ;;  %vm669_vm10 = vmand %vm668_vm8, %vm449_vm4  ;;  %v182_v62 = vadd.f32 %v181_v35, %v167_v57 }
 0x1a5   :  { %vm383_vm14 = vmand %vm351_vm13, %vm367_vm12 }
 0x1a6   :  { %v399_v36 = vsel %vm383_vm14, %v1125_v24, 0.0 }
 0x1a7   :  { %v414_v60 = vadd.f32 %v413_v3, %v399_v36  ;;  %v336_v21 = vpop.trf.xlu1 }
 0x1a8   :  { %vm352_vm1 = vcmp.eq.f32.partialorder %v336_v21, %v941_v40 }
 0x1a9   :  { %vm384_vm2 = vmand %vm352_vm1, %vm368_vm0 }
 0x1aa   :  { %v400_v61 = vsel %vm384_vm2, %v1132_v14, 0.0 }
 0x1ab   :  { %v415_v8 = vadd.f32 %v414_v60, %v400_v61  ;;  %v1323_v4 = vpop.trf.xlu1 }
 0x1ad   :  { %v416_v51 = vrot.slane %v415_v8, 4 }
 0x1af   :  { %v417_v16 = vadd.f32 %v416_v51, %v415_v8  ;;  %v1329_v20 = vpop.trf.xlu1 }
 0x1b1   :  { %v418_v10 = vrot.slane %v417_v16, 2 }
 0x1b3   :  { %v1334_v9 = vpop.trf.xlu1  ;;  %v419_v23 = vadd.f32 %v418_v10, %v417_v16 }
 0x1b5   :  { %v420_v46 = vrot.slane %v419_v23, 1 }
 0x1b7   :  { %v473_v25 = vpop.trf.xlu1  ;;  %v421_v12 = vadd.f32 %v420_v46, %v419_v23 }
 0x1b9   :  { %v670_v54 = vsel %vm669_vm10, 0.0, %v421_v12 }
 0x1ba   :  { %672 = vst [vmem:[#allocation8] sm:$0x1] %v670_v54 }
 0x1bb   :  { %v474_v28 = vpop.trf.xlu1 }
 0x1bc   :  { %803 = shalt.err (!%p800_p7)
}
 0x1bd   :  { %694 = dma.vmem_to_hbm [thread:$0]  %s692_s26, 16, %s1422_s4, [#allocation9]  }
 0x1be   :  { %s812_s6 = scalar_lea.vmem %s702_s27, 16  ;;  %s816_s7 = scalar_lea.vmem %s702_s27, 32 }
 0x1bf   :  { %p813_p8 = scmp.ne.s32.totalorder %s702_s27, %s812_s6  ;;  %p817_p9 = scmp.lt.s32.totalorder %s702_s27, %s702_s27 }
 0x1c0   :  { %p818_p10 = scmp.lt.s32.totalorder %s816_s7, %s812_s6 }
 0x1c2   :  { %p819_p11 = por %p818_p10, %p817_p9 }
 0x1c4   :  { %p820_p12 = pnand %p819_p11, %p813_p8 }
 0x1c6   :  { %823 = shalt.err (!%p820_p12)
}
 0x1c7   :  { %704 = dma.vmem_to_hbm [thread:$0]  %s702_s27, 16, %s1423_s5, [#allocation9]   ;;  %v183_v40 = vadd.f32 %v182_v62, %v168_v45  ;;  %v169_v43 = vsel %vm153_vm11, %v1105_v31, 0.0  ;;  %vm154_vm4 = vcmp.eq.s32.totalorder %v1021_v11, %v1295_v37  ;;  %v475_v1 = vpop.trf.xlu1  ;;  %vm155_vm12 = vcmp.eq.s32.totalorder %v1030_v15, %v1295_v37  ;;  %v1449_v58 = vld [vmem:[#allocation15_spill] sm:$0xff]  ;;  %v1450_v7 = vld [vmem:[#allocation21_spill] sm:$0xff]  ;;  %v1451_v15 = vld [vmem:[#allocation16_spill] sm:$0xff] }
 0x1c8   :  { %v170_v18 = vsel %vm154_vm4, %v1107_v32, 0.0  ;;  %v171_v41 = vsel %vm155_vm12, %v1109_v34, 0.0  ;;  %vm156_vm13 = vcmp.eq.s32.totalorder %v1449_v58, %v1295_v37  ;;  %vm487_vm14 = vcmp.lt.f32.partialorder %v1329_v20, %v1450_v7  ;;  %v1452_v27 = vld [vmem:[#allocation17_spill] sm:$0xff]  ;;  %s720_s4 = sld [smem:[#allocation2 + $0x3]]  ;;  %s865_s10 = smov [#allocation7]  }
 0x1c9   :  { %v184_v29 = vadd.f32 %v183_v40, %v169_v43  ;;  %v172_v11 = vsel %vm156_vm13, %v1112_v44, 0.0  ;;  %vm486_vm15 = vcmp.lt.f32.partialorder %v1323_v4, %v1450_v7  ;;  %vm488_vm0 = vcmp.lt.f32.partialorder %v1334_v9, %v1450_v7  ;;  %s681_s11 = sshll.u32 %s865_s10, 4  ;;  %s682_s11 = int_to_ptr.vmem [resolvable:$true] %s681_s11 }
 0x1ca   :  { %vm157_vm1 = vcmp.eq.s32.totalorder %v1451_v15, %v1295_v37  ;;  %v731_v32 = vsel %vm487_vm14, 1.0, %v1444_v39  ;;  %vm489_vm2 = vcmp.lt.f32.partialorder %v473_v25, %v1450_v7  ;;  %v730_v59 = vsel %vm486_vm15, 1.0, %v1444_v39  ;;  %s832_s12 = scalar_lea.vmem %s682_s11, 16  ;;  %s836_s13 = scalar_lea.vmem %s682_s11, 32 }
 0x1cb   :  { %v476_v30 = vpop.trf.xlu1  ;;  %v185_v19 = vadd.f32 %v184_v29, %v170_v18  ;;  %v732_v22 = vsel %vm488_vm0, 1.0, %v1444_v39  ;;  %v173_v44 = vsel %vm157_vm1, %v1114_v56, 0.0  ;;  %v534_v3 = vadd.f32 %v731_v32, %v730_v59  ;;  %v1453_v56 = vld [vmem:[#allocation18_spill] sm:$0xff]  ;;  %p833_p13 = scmp.ne.s32.totalorder %s682_s11, %s832_s12  ;;  %p837_p0 = scmp.lt.s32.totalorder %s682_s11, %s682_s11 }
 0x1cc   :  { %vm490_vm3 = vcmp.lt.f32.partialorder %v474_v28, %v1450_v7  ;;  %vm158_vm5 = vcmp.eq.s32.totalorder %v1452_v27, %v1295_v37  ;;  %v733_v50 = vsel %vm489_vm2, 1.0, %v1444_v39  ;;  %vm491_vm7 = vcmp.lt.f32.partialorder %v475_v1, %v1450_v7  ;;  %p838_p1 = scmp.lt.s32.totalorder %s836_s13, %s832_s12 }
 0x1cd   :  { %v186_v31 = vadd.f32 %v185_v19, %v171_v41  ;;  %v535_v49 = vadd.f32 %v732_v22, %v534_v3  ;;  %v734_v60 = vsel %vm490_vm3, 1.0, %v1444_v39  ;;  %v174_v21 = vsel %vm158_vm5, %v1117_v0, 0.0  ;;  %v1454_v0 = vld [vmem:[#allocation19_spill] sm:$0xff] }
 0x1ce   :  { %vm492_vm8 = vcmp.lt.f32.partialorder %v476_v30, %v1450_v7  ;;  %vm159_vm9 = vcmp.eq.s32.totalorder %v1453_v56, %v1295_v37  ;;  %v735_v48 = vsel %vm491_vm7, 1.0, %v1444_v39  ;;  %vm160_vm4 = vcmp.eq.s32.totalorder %v1454_v0, %v1295_v37  ;;  %s445_s5 = scvt.s32.f32 %s720_s4  ;;  %p839_p2 = por %p838_p1, %p837_p0 }
 0x1cf   :  { %v477_v2 = vpop.trf.xlu1  ;;  %v187_v26 = vadd.f32 %v186_v31, %v172_v11  ;;  %v536_v52 = vadd.f32 %v733_v50, %v535_v49  ;;  %v736_v4 = vsel %vm492_vm8, 1.0, %v1444_v39  ;;  %v175_v53 = vsel %vm159_vm9, %v1125_v24, 0.0 }
 0x1d0   :  { %vm493_vm10 = vcmp.lt.f32.partialorder %v477_v2, %v1450_v7  ;;  %v176_v20 = vsel %vm160_vm4, %v1132_v14, 0.0  ;;  %v555_v32 = vstv %s445_s5  ;;  %p840_p3 = pnand %p839_p2, %p833_p13 }
 0x1d1   :  { %v188_v36 = vadd.f32 %v187_v26, %v173_v44  ;;  %v537_v61 = vadd.f32 %v734_v60, %v536_v52  ;;  %v737_v51 = vsel %vm493_vm10, 1.0, %v1444_v39 }
 0x1d3   :  { %v478_v34 = vpop.trf.xlu1  ;;  %v189_v8 = vadd.f32 %v188_v36, %v174_v21  ;;  %v538_v5 = vadd.f32 %v735_v48, %v537_v61 }
 0x1d4   :  { %vm494_vm11 = vcmp.lt.f32.partialorder %v478_v34, %v1450_v7 }
 0x1d5   :  { %v539_v63 = vadd.f32 %v736_v4, %v538_v5  ;;  %v190_v17 = vadd.f32 %v189_v8, %v175_v53  ;;  %v738_v16 = vsel %vm494_vm11, 1.0, %v1444_v39 }
 0x1d7   :  { %v479_v33 = vpop.trf.xlu1  ;;  %v540_v38 = vadd.f32 %v737_v51, %v539_v63  ;;  %v191_v37 = vadd.f32 %v190_v17, %v176_v20 }
 0x1d8   :  { %vm495_vm12 = vcmp.lt.f32.partialorder %v479_v33, %v1450_v7 }
 0x1d9   :  { %v739_v24 = vsel %vm495_vm12, 1.0, %v1444_v39  ;;  %v541_v55 = vadd.f32 %v738_v16, %v540_v38  ;;  %v192_v14 = vrot.slane %v191_v37, 4 }
 0x1db   :  { %v480_v13 = vpop.trf.xlu1  ;;  %v542_v47 = vadd.f32 %v739_v24, %v541_v55  ;;  %v193_v54 = vadd.f32 %v192_v14, %v191_v37 }
 0x1dc   :  { %vm496_vm13 = vcmp.lt.f32.partialorder %v480_v13, %v1450_v7 }
 0x1dd   :  { %v740_v6 = vsel %vm496_vm13, 1.0, %v1444_v39  ;;  %v194_v1 = vrot.slane %v193_v54, 2 }
 0x1de   :  { %v543_v35 = vadd.f32 %v740_v6, %v542_v47 }
 0x1df   :  { %v481_v42 = vpop.trf.xlu1  ;;  %v195_v19 = vadd.f32 %v194_v1, %v193_v54 }
 0x1e0   :  { %vm497_vm14 = vcmp.lt.f32.partialorder %v481_v42, %v1450_v7 }
 0x1e1   :  { %v741_v9 = vsel %vm497_vm14, 1.0, %v1444_v39  ;;  %v196_v2 = vrot.slane %v195_v19, 1 }
 0x1e2   :  { %v544_v57 = vadd.f32 %v741_v9, %v543_v35 }
 0x1e3   :  { %v482_v10 = vpop.trf.xlu1  ;;  %v197_v15 = vadd.f32 %v196_v2, %v195_v19 }
 0x1e4   :  { %vm498_vm15 = vcmp.lt.f32.partialorder %v482_v10, %v1450_v7 }
 0x1e5   :  { %v742_v46 = vsel %vm498_vm15, 1.0, %v1444_v39  ;;  %v200_v26 = vsel %vm1121_vm6, %v197_v15, 0.0 }
 0x1e6   :  { %v545_v62 = vadd.f32 %v742_v46, %v544_v57 }
 0x1e7   :  { %v483_v23 = vpop.trf.xlu1 }
 0x1e8   :  { %vm499_vm0 = vcmp.lt.f32.partialorder %v483_v23, %v1450_v7 }
 0x1e9   :  { %v743_v25 = vsel %vm499_vm0, 1.0, %v1444_v39 }
 0x1ea   :  { %v546_v28 = vadd.f32 %v743_v25, %v545_v62 }
 0x1eb   :  { %v484_v12 = vpop.trf.xlu1 }
 0x1ec   :  { %vm500_vm1 = vcmp.lt.f32.partialorder %v484_v12, %v1450_v7 }
 0x1ed   :  { %v744_v45 = vsel %vm500_vm1, 1.0, %v1444_v39 }
 0x1ee   :  { %v547_v43 = vadd.f32 %v744_v45, %v546_v28 }
 0x1ef   :  { %v485_v40 = vpop.trf.xlu1 }
 0x1f0   :  { %vm501_vm2 = vcmp.lt.f32.partialorder %v485_v40, %v1450_v7 }
 0x1f1   :  { %v745_v29 = vsel %vm501_vm2, 1.0, %v1444_v39 }
 0x1f2   :  { %v548_v18 = vadd.f32 %v745_v29, %v547_v43 }
 0x1f4   :  { %v549_v30 = vrot.slane %v548_v18, 4 }
 0x1f6   :  { %v550_v41 = vadd.f32 %v549_v30, %v548_v18 }
 0x1f8   :  { %v551_v58 = vrot.slane %v550_v41, 2 }
 0x1fa   :  { %v552_v31 = vadd.f32 %v551_v58, %v550_v41 }
 0x1fc   :  { %v553_v11 = vrot.slane %v552_v31, 1 }
 0x1fe   :  { %v554_v34 = vadd.f32 %v553_v11, %v552_v31 }
 0x200   :  { %vm556_vm3 = vcmp.lt.f32.partialorder %v554_v34, %v555_v32 }
 0x201   :  { %vm557_vm5 = vmand %vm556_vm3, %vm1121_vm6 }
 0x202   :  { %v558_v39 = vsel %vm557_vm5, 0.0, %v200_v26 }
 0x203   :  { %671 = vst [vmem:[#allocation7] sm:$0x1] %v558_v39 }
 0x204   :  { %843 = shalt.err (!%p840_p3)
}
 0x205   :  { %684 = dma.vmem_to_hbm [thread:$0]  %s682_s11, 16, %s1421_s3, [#allocation3]  }
 0x206   :  { %856 = dma.done.wait [#allocation3], 16  }
 0x207   :  { %857 = vsyncadd [#allocation3], 4294967280 }
 0x208   :  { %858 = dma.done.wait [#allocation9], 32  }
 0x209   :  { %859 = vsyncadd [#allocation9], 4294967264 }
 0x20a   :  { %714 = vsyncpa [#allocation3], 1 }
 0x20b   :  { %715 = vsyncpa [#allocation9], 1 }
 0x20c   :  { %716 = vsyncpa [#allocation4], 1 }
 0x20d   :  { %717 = vsyncpa [#allocation5], 1 }

</bundles_post_ra>
